<compile_context>
chip_gen: v6e
topology: v6e:2x2x1
jax: 0.10.0
libtpu: 0.0.40
codegen_flags: <defaults>
</compile_context>

<pallas_src>
import functools

import jax
import jax.numpy as jnp
from jax import lax
from jax.experimental import pallas as pl
from jax.experimental.pallas import tpu as pltpu


# ----------------------------- Pallas kernel --------------------------------

def _intermediate_kernel(x_ref, res_ref, w_ref, b_ref, g_ref, beta_ref,
                         o_ref, *, eps):
    """One grid step = one tile of tm rows (rows = flattened batch*seq).

    x_ref    : [tm, I]  hidden_states rows (input to the dense layer)
    res_ref  : [tm, H]  input_tensor rows (residual)
    w_ref    : [I,  H]  dense weight, stored [in, out] (torch weight.T)
    b_ref    : [1,  H]  dense bias
    g_ref    : [1,  H]  LayerNorm weight (gamma)
    beta_ref : [1,  H]  LayerNorm bias  (beta)
    o_ref    : [tm, H]  output rows
    """
    # Dense projection on the MXU, f32 accumulation (bf16 inputs -> bf16 rate).
    h = jnp.dot(x_ref[...], w_ref[...], preferred_element_type=jnp.float32)
    h = h + b_ref[0].astype(jnp.float32)

    # TODO(synk): training-mode dropout (pltpu.prng_seed + prng_random_bits)
    # omitted; eval mode -> identity.

    # Residual add in f32.
    h = h + res_ref[...].astype(jnp.float32)

    # LayerNorm over the hidden dimension, one-pass statistics:
    #   var = E[h^2] - mean^2   (single traversal of h)
    hdim = h.shape[-1]
    inv_h = jnp.float32(1.0 / hdim)
    s = jnp.sum(h, axis=-1, keepdims=True)
    sq = jnp.sum(h * h, axis=-1, keepdims=True)
    mean = s * inv_h
    var = jnp.maximum(sq * inv_h - mean * mean, 0.0)
    inv = lax.rsqrt(var + eps)
    y = (h - mean) * inv * g_ref[0].astype(jnp.float32) \
        + beta_ref[0].astype(jnp.float32)

    # Single lane-dense store of the whole [tm, H] block.
    o_ref[...] = y.astype(o_ref.dtype)


# ------------------------------- Wrapper -------------------------------------

def _tpu_budget():
    """(tile VMEM budget, VMEM hard cap, max row tile) per TPU generation."""
    kind = ""
    try:
        kind = jax.devices()[0].device_kind.lower()
    except Exception:
        pass
    if "v7" in kind:
        # 64 MiB VMEM per TC, 2 TCs -> smaller tiles, leave headroom.
        return 40 << 20, 60 << 20, 256
    if "v6" in kind:
        # 128 MiB VMEM, fast HBM -> large row tiles amortize grid overhead.
        return 80 << 20, 120 << 20, 1024
    # v5e / unknown: be conservative (small scoped default, 128 MiB physical).
    return 48 << 20, 100 << 20, 512


def blip2_qformer_intermediate(hidden_states, input_tensor, params,
                               *, eps=1e-12, matmul_dtype=None):
    """Mirrors the given Blip2QFormerIntermediate.forward (eval mode).

    hidden_states : [B, S, intermediate_size]
    input_tensor  : [B, S, hidden_size]
    params        : dict with
        "w"     [intermediate_size, hidden_size]   (torch dense.weight.T)
        "b"     [1, hidden_size]
        "gamma" [1, hidden_size]
        "beta"  [1, hidden_size]
    matmul_dtype  : optional (e.g. jnp.bfloat16) dtype for the MXU matmul;
                    accumulation and LayerNorm stay in f32.
    returns       : [B, S, hidden_size]
    """
    B, S, I = hidden_states.shape
    H = params["w"].shape[1]
    assert input_tensor.shape == (B, S, H)
    out_dtype = input_tensor.dtype

    M = B * S
    x2d = hidden_states.reshape(M, I)
    r2d = input_tensor.reshape(M, H)
    w = params["w"]
    if matmul_dtype is not None:
        # Cast at the wrapper boundary: halves the x / w DMA bytes too.
        x2d = x2d.astype(matmul_dtype)
        w = w.astype(matmul_dtype)

    # Sublane alignment of the row dimension depends on the packed dtype.
    xi = x2d.dtype.itemsize
    align = 8 if xi >= 4 else (16 if xi == 2 else 32)

    tile_budget, vmem_cap, max_rows = _tpu_budget()

    ix, ir, iw = x2d.dtype.itemsize, r2d.dtype.itemsize, w.dtype.itemsize
    io = jnp.dtype(out_dtype).itemsize
    weight_bytes = I * H * iw
    param_bytes = 3 * H * 4
    per_row = I * ix + H * ir + H * io     # x + residual + out bytes per row
    ln_row = H * 4                         # f32 LN intermediate per row

    # Derive the row tile from the VMEM budget (weight resident once).
    avail = max(tile_budget - weight_bytes - param_bytes, 0)
    tm_budget = max(avail // (2 * per_row + ln_row), align)
    m_ceil = -(-M // align) * align
    tm = min(max_rows, tm_budget, m_ceil)
    tm = max((tm // align) * align, align)

    n_blocks = -(-M // tm)
    m_pad = n_blocks * tm
    if m_pad != M:
        x2d = jnp.pad(x2d, ((0, m_pad - M), (0, 0)))
        r2d = jnp.pad(r2d, ((0, m_pad - M), (0, 0)))

    kernel = functools.partial(_intermediate_kernel, eps=eps)
    const2d = lambda i: (0, 0)

    def run(single_buffer_params):
        wfac = 1 if single_buffer_params else 2
        vmem_needed = (wfac * weight_bytes + 2 * param_bytes
                       + 2 * tm * per_row + tm * ln_row + (4 << 20))
        vmem_limit = int(min(vmem_cap, max(vmem_needed, 16 << 20)))
        pm = pl.Buffered(1) if single_buffer_params else None

        in_specs = [
            pl.BlockSpec((tm, I), lambda i: (i, 0)),   # hidden_states rows
            pl.BlockSpec((tm, H), lambda i: (i, 0)),   # residual rows
            pl.BlockSpec((I, H), const2d, pipeline_mode=pm),   # dense weight
            pl.BlockSpec((1, H), const2d, pipeline_mode=pm),   # dense bias
            pl.BlockSpec((1, H), const2d, pipeline_mode=pm),   # LN gamma
            pl.BlockSpec((1, H), const2d, pipeline_mode=pm),   # LN beta
        ]
        return pl.pallas_call(
            kernel,
            out_shape=jax.ShapeDtypeStruct((m_pad, H), out_dtype),
            grid=(n_blocks,),
            in_specs=in_specs,
            out_specs=pl.BlockSpec((tm, H), lambda i: (i, 0)),
            compiler_params=pltpu.CompilerParams(
                dimension_semantics=("parallel",),
                vmem_limit_bytes=vmem_limit),
        )(x2d, r2d, w, params["b"], params["gamma"], params["beta"])

    try:
        out2d = run(True)          # single-buffered grid-invariant operands
    except Exception:
        out2d = run(False)         # fallback: default double buffering

    if m_pad != M:
        out2d = out2d[:M]
    return out2d.reshape(B, S, H)


# ------------------------- Pure-JAX reference --------------------------------

def _reference(hidden_states, input_tensor, params, eps=1e-12):
    h = hidden_states @ params["w"] + params["b"][0]
    h = h + input_tensor
    mean = jnp.mean(h, axis=-1, keepdims=True)
    var = jnp.mean((h - mean) ** 2, axis=-1, keepdims=True)
    y = (h - mean) / jnp.sqrt(var + eps)
    return y * params["gamma"][0] + params["beta"][0]


# --------------------------------- Main ---------------------------------------

if __name__ == "__main__":
    # Small config consistent with the module: intermediate_size=64, hidden=32.
    B, S = 2, 8
    intermediate_size, hidden_size = 64, 32
    eps = 1e-12

    key = jax.random.PRNGKey(0)
    k0, k1, k2, k3, k4, k5 = jax.random.split(key, 6)

    hidden_states = jax.random.normal(k0, (B, S, intermediate_size),
                                      dtype=jnp.float32)
    input_tensor = jax.random.normal(k1, (B, S, hidden_size), dtype=jnp.float32)

    params = {
        "w": 0.1 * jax.random.normal(k2, (intermediate_size, hidden_size),
                                     dtype=jnp.float32),
        "b": 0.1 * jax.random.normal(k3, (1, hidden_size), dtype=jnp.float32),
        "gamma": 1.0 + 0.1 * jax.random.normal(k4, (1, hidden_size),
                                               dtype=jnp.float32),
        "beta": 0.1 * jax.random.normal(k5, (1, hidden_size),
                                        dtype=jnp.float32),
    }

    ref = _reference(hidden_states, input_tensor, params, eps=eps)

    # f32 path (tight tolerance).
    out = blip2_qformer_intermediate(hidden_states, input_tensor, params,
                                     eps=eps)
    out = jax.block_until_ready(out)
    assert out.shape == (B, S, hidden_size)
    assert jnp.allclose(out, ref, atol=1e-4, rtol=1e-4), "f32 output mismatch"

    # bf16 matmul path (perf configuration; looser tolerance).
    out_bf16 = blip2_qformer_intermediate(hidden_states, input_tensor, params,
                                          eps=eps, matmul_dtype=jnp.bfloat16)
    out_bf16 = jax.block_until_ready(out_bf16)
    assert jnp.allclose(out_bf16, ref, atol=5e-2, rtol=5e-2), \
        "bf16 output mismatch"

    print("KERNEL_OK")
</pallas_src>

<mosaic_0001>
module attributes {stable_mosaic.version = 11 : i64} {
  func.func @_intermediate_kernel(%arg0: i32, %arg1: memref<16x64xf32, #tpu.memory_space<vmem>>, %arg2: memref<16x32xf32, #tpu.memory_space<vmem>>, %arg3: memref<64x32xf32, #tpu.memory_space<vmem>>, %arg4: memref<1x32xf32, #tpu.memory_space<vmem>>, %arg5: memref<1x32xf32, #tpu.memory_space<vmem>>, %arg6: memref<1x32xf32, #tpu.memory_space<vmem>>, %arg7: memref<16x32xf32, #tpu.memory_space<vmem>>) attributes {dimension_semantics = [#tpu.dimension_semantics<parallel>], iteration_bounds = array<i64: 1>, scalar_prefetch = 0 : i64, scratch_operands = 0 : i64, tpu.core_type = #tpu.core_type<tc>, window_params = [{transform_indices = @transform_0, window_bounds = array<i64: 16, 64>}, {transform_indices = @transform_1, window_bounds = array<i64: 16, 32>}, {pipeline_mode = #tpu.pipeline_mode<synchronous>, transform_indices = @transform_2, window_bounds = array<i64: 64, 32>}, {pipeline_mode = #tpu.pipeline_mode<synchronous>, transform_indices = @transform_3, window_bounds = array<i64: 1, 32>}, {pipeline_mode = #tpu.pipeline_mode<synchronous>, transform_indices = @transform_4, window_bounds = array<i64: 1, 32>}, {pipeline_mode = #tpu.pipeline_mode<synchronous>, transform_indices = @transform_5, window_bounds = array<i64: 1, 32>}, {transform_indices = @transform_6, window_bounds = array<i64: 16, 32>}]} {
    %c0 = arith.constant 0 : index
    %c0_0 = arith.constant 0 : index
    %0 = vector.load %arg1[%c0, %c0_0] : memref<16x64xf32, #tpu.memory_space<vmem>>, vector<16x64xf32>
    %c0_1 = arith.constant 0 : index
    %c0_2 = arith.constant 0 : index
    %1 = vector.load %arg3[%c0_1, %c0_2] : memref<64x32xf32, #tpu.memory_space<vmem>>, vector<64x32xf32>
    %cst = arith.constant dense<0.000000e+00> : vector<16x32xf32>
    %2 = tpu.matmul %0, %1, %cst {dimension_numbers = #tpu.dot_dimension_numbers<[1], [0], [0], [1], [0, 0, 1, 1], [], []>} : vector<16x64xf32>, vector<64x32xf32>, vector<16x32xf32> -> vector<16x32xf32>
    %c0_3 = arith.constant 0 : index
    %c0_4 = arith.constant 0 : index
    %3 = vector.load %arg4[%c0_3, %c0_4] : memref<1x32xf32, #tpu.memory_space<vmem>>, vector<1x32xf32>
    %4 = vector.shape_cast %3 : vector<1x32xf32> to vector<32xf32>
    %5 = vector.shape_cast %4 : vector<32xf32> to vector<1x32xf32>
    %6 = vector.broadcast %5 : vector<1x32xf32> to vector<16x32xf32>
    %7 = arith.addf %2, %6 : vector<16x32xf32>
    %c0_5 = arith.constant 0 : index
    %c0_6 = arith.constant 0 : index
    %8 = vector.load %arg2[%c0_5, %c0_6] : memref<16x32xf32, #tpu.memory_space<vmem>>, vector<16x32xf32>
    %9 = arith.addf %7, %8 : vector<16x32xf32>
    %cst_7 = arith.constant dense<0.000000e+00> : vector<16xf32>
    %10 = vector.multi_reduction <add>, %9, %cst_7 [1] : vector<16x32xf32> to vector<16xf32>
    %11 = vector.shape_cast %10 : vector<16xf32> to vector<16x1xf32>
    %12 = arith.mulf %9, %9 : vector<16x32xf32>
    %cst_8 = arith.constant dense<0.000000e+00> : vector<16xf32>
    %13 = vector.multi_reduction <add>, %12, %cst_8 [1] : vector<16x32xf32> to vector<16xf32>
    %14 = vector.shape_cast %13 : vector<16xf32> to vector<16x1xf32>
    %cst_9 = arith.constant 3.125000e-02 : f32
    %15 = vector.broadcast %cst_9 : f32 to vector<16x1xf32>
    %16 = arith.mulf %11, %15 : vector<16x1xf32>
    %cst_10 = arith.constant 3.125000e-02 : f32
    %17 = vector.broadcast %cst_10 : f32 to vector<16x1xf32>
    %18 = arith.mulf %14, %17 : vector<16x1xf32>
    %19 = arith.mulf %16, %16 : vector<16x1xf32>
    %20 = arith.subf %18, %19 : vector<16x1xf32>
    %cst_11 = arith.constant 0.000000e+00 : f32
    %21 = vector.broadcast %cst_11 : f32 to vector<16x1xf32>
    %22 = arith.maximumf %20, %21 : vector<16x1xf32>
    %cst_12 = arith.constant 9.99999996E-13 : f32
    %23 = vector.broadcast %cst_12 : f32 to vector<16x1xf32>
    %24 = arith.addf %22, %23 : vector<16x1xf32>
    %25 = math.rsqrt %24 : vector<16x1xf32>
    %26 = vector.broadcast %16 : vector<16x1xf32> to vector<16x32xf32>
    %27 = arith.subf %9, %26 : vector<16x32xf32>
    %28 = vector.broadcast %25 : vector<16x1xf32> to vector<16x32xf32>
    %29 = arith.mulf %27, %28 : vector<16x32xf32>
    %c0_13 = arith.constant 0 : index
    %c0_14 = arith.constant 0 : index
    %30 = vector.load %arg5[%c0_13, %c0_14] : memref<1x32xf32, #tpu.memory_space<vmem>>, vector<1x32xf32>
    %31 = vector.shape_cast %30 : vector<1x32xf32> to vector<32xf32>
    %32 = vector.shape_cast %31 : vector<32xf32> to vector<1x32xf32>
    %33 = vector.broadcast %32 : vector<1x32xf32> to vector<16x32xf32>
    %34 = arith.mulf %29, %33 : vector<16x32xf32>
    %c0_15 = arith.constant 0 : index
    %c0_16 = arith.constant 0 : index
    %35 = vector.load %arg6[%c0_15, %c0_16] : memref<1x32xf32, #tpu.memory_space<vmem>>, vector<1x32xf32>
    %36 = vector.shape_cast %35 : vector<1x32xf32> to vector<32xf32>
    %37 = vector.shape_cast %36 : vector<32xf32> to vector<1x32xf32>
    %38 = vector.broadcast %37 : vector<1x32xf32> to vector<16x32xf32>
    %39 = arith.addf %34, %38 : vector<16x32xf32>
    %c0_17 = arith.constant 0 : index
    %c0_18 = arith.constant 0 : index
    %40 = vector.load %arg7[%c0_17, %c0_18] : memref<16x32xf32, #tpu.memory_space<vmem>>, vector<16x32xf32>
    tpu.vector_store %arg7[%c0_17, %c0_18], %39 {strides = array<i32>} : memref<16x32xf32, #tpu.memory_space<vmem>>, vector<16x32xf32>,
    return
  }
  func.func @transform_0(%arg0: i32) -> (i32, i32) {
    %c0_i32 = arith.constant 0 : i32
    %c0_i32_0 = arith.constant 0 : i32
    return %arg0, %c0_i32 : i32, i32
  }
  func.func @transform_1(%arg0: i32) -> (i32, i32) {
    %c0_i32 = arith.constant 0 : i32
    %c0_i32_0 = arith.constant 0 : i32
    return %arg0, %c0_i32 : i32, i32
  }
  func.func @transform_2(%arg0: i32) -> (i32, i32) {
    %c0_i32 = arith.constant 0 : i32
    %c0_i32_0 = arith.constant 0 : i32
    %c0_i32_1 = arith.constant 0 : i32
    return %c0_i32, %c0_i32_0 : i32, i32
  }
  func.func @transform_3(%arg0: i32) -> (i32, i32) {
    %c0_i32 = arith.constant 0 : i32
    %c0_i32_0 = arith.constant 0 : i32
    %c0_i32_1 = arith.constant 0 : i32
    return %c0_i32, %c0_i32_0 : i32, i32
  }
  func.func @transform_4(%arg0: i32) -> (i32, i32) {
    %c0_i32 = arith.constant 0 : i32
    %c0_i32_0 = arith.constant 0 : i32
    %c0_i32_1 = arith.constant 0 : i32
    return %c0_i32, %c0_i32_0 : i32, i32
  }
  func.func @transform_5(%arg0: i32) -> (i32, i32) {
    %c0_i32 = arith.constant 0 : i32
    %c0_i32_0 = arith.constant 0 : i32
    %c0_i32_1 = arith.constant 0 : i32
    return %c0_i32, %c0_i32_0 : i32, i32
  }
  func.func @transform_6(%arg0: i32) -> (i32, i32) {
    %c0_i32 = arith.constant 0 : i32
    %c0_i32_0 = arith.constant 0 : i32
    return %arg0, %c0_i32 : i32, i32
  }
}

module attributes {stable_mosaic.version = 11 : i64} {
  func.func @_intermediate_kernel(%arg0: i32, %arg1: memref<16x64xf32, #tpu.memory_space<vmem>>, %arg2: memref<16x32xf32, #tpu.memory_space<vmem>>, %arg3: memref<64x32xf32, #tpu.memory_space<vmem>>, %arg4: memref<1x32xf32, #tpu.memory_space<vmem>>, %arg5: memref<1x32xf32, #tpu.memory_space<vmem>>, %arg6: memref<1x32xf32, #tpu.memory_space<vmem>>, %arg7: memref<16x32xf32, #tpu.memory_space<vmem>>) attributes {dimension_semantics = [#tpu.dimension_semantics<parallel>], iteration_bounds = array<i64: 1>, scalar_prefetch = 0 : i64, scratch_operands = 0 : i64, tpu.core_type = #tpu.core_type<tc>, window_params = [{transform_indices = @transform_0, window_bounds = array<i64: 16, 64>}, {transform_indices = @transform_1, window_bounds = array<i64: 16, 32>}, {pipeline_mode = #tpu.pipeline_mode<synchronous>, transform_indices = @transform_2, window_bounds = array<i64: 64, 32>}, {pipeline_mode = #tpu.pipeline_mode<synchronous>, transform_indices = @transform_3, window_bounds = array<i64: 1, 32>}, {pipeline_mode = #tpu.pipeline_mode<synchronous>, transform_indices = @transform_4, window_bounds = array<i64: 1, 32>}, {pipeline_mode = #tpu.pipeline_mode<synchronous>, transform_indices = @transform_5, window_bounds = array<i64: 1, 32>}, {transform_indices = @transform_6, window_bounds = array<i64: 16, 32>}]} {
    %c0 = arith.constant 0 : index
    %c0_0 = arith.constant 0 : index
    %0 = vector.load %arg1[%c0, %c0_0] : memref<16x64xf32, #tpu.memory_space<vmem>>, vector<16x64xf32>
    %c0_1 = arith.constant 0 : index
    %c0_2 = arith.constant 0 : index
    %1 = vector.load %arg3[%c0_1, %c0_2] : memref<64x32xf32, #tpu.memory_space<vmem>>, vector<64x32xf32>
    %cst = arith.constant dense<0.000000e+00> : vector<16x32xf32>
    %2 = tpu.matmul %0, %1, %cst {dimension_numbers = #tpu.dot_dimension_numbers<[1], [0], [0], [1], [0, 0, 1, 1], [], []>} : vector<16x64xf32>, vector<64x32xf32>, vector<16x32xf32> -> vector<16x32xf32>
    %c0_3 = arith.constant 0 : index
    %c0_4 = arith.constant 0 : index
    %3 = vector.load %arg4[%c0_3, %c0_4] : memref<1x32xf32, #tpu.memory_space<vmem>>, vector<1x32xf32>
    %4 = vector.shape_cast %3 : vector<1x32xf32> to vector<32xf32>
    %5 = vector.shape_cast %4 : vector<32xf32> to vector<1x32xf32>
    %6 = vector.broadcast %5 : vector<1x32xf32> to vector<16x32xf32>
    %7 = arith.addf %2, %6 : vector<16x32xf32>
    %c0_5 = arith.constant 0 : index
    %c0_6 = arith.constant 0 : index
    %8 = vector.load %arg2[%c0_5, %c0_6] : memref<16x32xf32, #tpu.memory_space<vmem>>, vector<16x32xf32>
    %9 = arith.addf %7, %8 : vector<16x32xf32>
    %cst_7 = arith.constant dense<0.000000e+00> : vector<16xf32>
    %10 = vector.multi_reduction <add>, %9, %cst_7 [1] : vector<16x32xf32> to vector<16xf32>
    %11 = vector.shape_cast %10 : vector<16xf32> to vector<16x1xf32>
    %12 = arith.mulf %9, %9 : vector<16x32xf32>
    %cst_8 = arith.constant dense<0.000000e+00> : vector<16xf32>
    %13 = vector.multi_reduction <add>, %12, %cst_8 [1] : vector<16x32xf32> to vector<16xf32>
    %14 = vector.shape_cast %13 : vector<16xf32> to vector<16x1xf32>
    %cst_9 = arith.constant 3.125000e-02 : f32
    %15 = vector.broadcast %cst_9 : f32 to vector<16x1xf32>
    %16 = arith.mulf %11, %15 : vector<16x1xf32>
    %cst_10 = arith.constant 3.125000e-02 : f32
    %17 = vector.broadcast %cst_10 : f32 to vector<16x1xf32>
    %18 = arith.mulf %14, %17 : vector<16x1xf32>
    %19 = arith.mulf %16, %16 : vector<16x1xf32>
    %20 = arith.subf %18, %19 : vector<16x1xf32>
    %cst_11 = arith.constant 0.000000e+00 : f32
    %21 = vector.broadcast %cst_11 : f32 to vector<16x1xf32>
    %22 = arith.maximumf %20, %21 : vector<16x1xf32>
    %cst_12 = arith.constant 9.99999996E-13 : f32
    %23 = vector.broadcast %cst_12 : f32 to vector<16x1xf32>
    %24 = arith.addf %22, %23 : vector<16x1xf32>
    %25 = math.rsqrt %24 : vector<16x1xf32>
    %26 = vector.broadcast %16 : vector<16x1xf32> to vector<16x32xf32>
    %27 = arith.subf %9, %26 : vector<16x32xf32>
    %28 = vector.broadcast %25 : vector<16x1xf32> to vector<16x32xf32>
    %29 = arith.mulf %27, %28 : vector<16x32xf32>
    %c0_13 = arith.constant 0 : index
    %c0_14 = arith.constant 0 : index
    %30 = vector.load %arg5[%c0_13, %c0_14] : memref<1x32xf32, #tpu.memory_space<vmem>>, vector<1x32xf32>
    %31 = vector.shape_cast %30 : vector<1x32xf32> to vector<32xf32>
    %32 = vector.shape_cast %31 : vector<32xf32> to vector<1x32xf32>
    %33 = vector.broadcast %32 : vector<1x32xf32> to vector<16x32xf32>
    %34 = arith.mulf %29, %33 : vector<16x32xf32>
    %c0_15 = arith.constant 0 : index
    %c0_16 = arith.constant 0 : index
    %35 = vector.load %arg6[%c0_15, %c0_16] : memref<1x32xf32, #tpu.memory_space<vmem>>, vector<1x32xf32>
    %36 = vector.shape_cast %35 : vector<1x32xf32> to vector<32xf32>
    %37 = vector.shape_cast %36 : vector<32xf32> to vector<1x32xf32>
    %38 = vector.broadcast %37 : vector<1x32xf32> to vector<16x32xf32>
    %39 = arith.addf %34, %38 : vector<16x32xf32>
    %c0_17 = arith.constant 0 : index
    %c0_18 = arith.constant 0 : index
    %40 = vector.load %arg7[%c0_17, %c0_18] : memref<16x32xf32, #tpu.memory_space<vmem>>, vector<16x32xf32>
    tpu.vector_store %arg7[%c0_17, %c0_18], %39 {strides = array<i32>} : memref<16x32xf32, #tpu.memory_space<vmem>>, vector<16x32xf32>,
    return
  }
  func.func @transform_0(%arg0: i32) -> (i32, i32) {
    %c0_i32 = arith.constant 0 : i32
    %c0_i32_0 = arith.constant 0 : i32
    return %arg0, %c0_i32 : i32, i32
  }
  func.func @transform_1(%arg0: i32) -> (i32, i32) {
    %c0_i32 = arith.constant 0 : i32
    %c0_i32_0 = arith.constant 0 : i32
    return %arg0, %c0_i32 : i32, i32
  }
  func.func @transform_2(%arg0: i32) -> (i32, i32) {
    %c0_i32 = arith.constant 0 : i32
    %c0_i32_0 = arith.constant 0 : i32
    %c0_i32_1 = arith.constant 0 : i32
    return %c0_i32, %c0_i32_0 : i32, i32
  }
  func.func @transform_3(%arg0: i32) -> (i32, i32) {
    %c0_i32 = arith.constant 0 : i32
    %c0_i32_0 = arith.constant 0 : i32
    %c0_i32_1 = arith.constant 0 : i32
    return %c0_i32, %c0_i32_0 : i32, i32
  }
  func.func @transform_4(%arg0: i32) -> (i32, i32) {
    %c0_i32 = arith.constant 0 : i32
    %c0_i32_0 = arith.constant 0 : i32
    %c0_i32_1 = arith.constant 0 : i32
    return %c0_i32, %c0_i32_0 : i32, i32
  }
  func.func @transform_5(%arg0: i32) -> (i32, i32) {
    %c0_i32 = arith.constant 0 : i32
    %c0_i32_0 = arith.constant 0 : i32
    %c0_i32_1 = arith.constant 0 : i32
    return %c0_i32, %c0_i32_0 : i32, i32
  }
  func.func @transform_6(%arg0: i32) -> (i32, i32) {
    %c0_i32 = arith.constant 0 : i32
    %c0_i32_0 = arith.constant 0 : i32
    return %arg0, %c0_i32 : i32, i32
  }
}

</mosaic_0001>

<bundles_post_ra>
// kernel: tpu_custom_call.1
= control target key start
LH: loop header
LB: loop body
LE: loop exit
PB: predicated region body
PF: predicated region fallthrough
CT: control target
= control target key end

     0   :  { %vm41_vm0 = vcmask 523264   ;;  %s353_s0 = inlined_call_operand.vmem [shape: f32[16,64], index: 0, kind: input, shape index: {}]   ;;  %s354_s1 = inlined_call_operand.vmem [shape: f32[16,32], index: 1, kind: input, shape index: {}]   ;;  %s355_s2 = inlined_call_operand.vmem [shape: f32[64,32], index: 2, kind: input, shape index: {}]   ;;  %s356_s3 = inlined_call_operand.vmem [shape: f32[1,32], index: 3, kind: input, shape index: {}]   ;;  %s357_s4 = inlined_call_operand.vmem [shape: f32[1,32], index: 4, kind: input, shape index: {}]   ;;  %s358_s5 = inlined_call_operand.vmem [shape: f32[1,32], index: 5, kind: input, shape index: {}]   ;;  %s359_s6 = inlined_call_operand.hbm [shape: f32[16,32], index: 6, kind: output, shape index: {}]  }
   0x1   :  { %v33_v0 = vld [vmem:[%s355_s2 + $0x38] sm:$0xff]  ;;  %v32_v1 = vld [vmem:[%s355_s2 + $0x30] sm:$0xff]  ;;  %v31_v2 = vld [vmem:[%s355_s2 + $0x28] sm:$0xff] }
   0x2   :  { %211 = vmatprep.subr.mxu0 %v33_v0  ;;  %v24_v3 = vld [vmem:[%s353_s0] sm:$0xff] }
   0x3   :  { %212 = vmatpush3.msra.mxu0 %v33_v0  ;;  %227 = vmatprep.mubr.msk.f32.mxu0 %vm41_vm0, %v24_v3 }
   0x4   :  { %213 = vmatprep.subr.mxu0 %v32_v1 }
   0x5   :  { %11 = vsyncpa [#allocation3], 0  ;;  %214 = vmatpush3.msra.mxu0 %v32_v1  ;;  %v30_v4 = vld [vmem:[%s355_s2 + $0x20] sm:$0xff]  ;;  %v29_v5 = vld [vmem:[%s355_s2 + $0x18] sm:$0xff]  ;;  %vm127_vm1 = vcmask 261120   ;;  %s259_s23 = smov [#allocation2]  }
   0x6   :  { %215 = vmatprep.subr.mxu0 %v31_v2  ;;  %v28_v6 = vld [vmem:[%s355_s2 + $0x10] sm:$0xff]  ;;  %v27_v7 = vld [vmem:[%s355_s2 + $0x8] sm:$0xff]  ;;  %v26_v8 = vld [vmem:[%s355_s2] sm:$0xff]  ;;  %s185_s24 = sshll.u32 %s259_s23, 4  ;;  %s186_s24 = int_to_ptr.vmem [resolvable:$true] %s185_s24 }
   0x7   :  { %216 = vmatpush3.msra.mxu0 %v31_v2  ;;  %v25_v9 = vld [vmem:[%s353_s0 + $0x8] sm:$0xff]  ;;  %v196_v10 = vld [vmem:[%s356_s3] ss:$0 sm:$0xff]  ;;  %p242_p1 = scmp.lt.s32.totalorder %s186_s24, %s186_s24 }
   0x8   :  { %217 = vmatprep.subr.mxu0 %v30_v4  ;;  %v124_v13 = vld [vmem:[%s354_s1 + $0x8] sm:$0xff]  ;;  %v123_v15 = vld [vmem:[%s354_s1] sm:$0xff] }
   0x9   :  { %218 = vmatpush3.msra.mxu0 %v30_v4  ;;  %v199_v43 = vld [vmem:[%s357_s4] ss:$0 sm:$0xff]  ;;  %s237_s4 = scalar_lea.vmem %s186_s24, 256 }
   0xa   :  { %219 = vmatprep.subr.mxu0 %v29_v5  ;;  %v200_v45 = vld [vmem:[%s358_s5] ss:$0 sm:$0xff]  ;;  %p238_p0 = scmp.ne.s32.totalorder %s186_s24, %s237_s4  ;;  %p243_p2 = scmp.lt.s32.totalorder %s237_s4, %s237_s4 }
   0xb   :  { %220 = vmatpush3.msra.mxu0 %v29_v5 }
   0xc   :  { %221 = vmatprep.subr.mxu0 %v28_v6  ;;  %p244_p3 = por %p243_p2, %p242_p1 }
   0xd   :  { %222 = vmatpush3.msra.mxu0 %v28_v6 }
   0xe   :  { %223 = vmatprep.subr.mxu0 %v27_v7  ;;  %p245_p4 = pnand %p244_p3, %p238_p0 }
   0xf   :  { %224 = vmatpush3.msra.mxu0 %v27_v7 }
  0x10   :  { %225 = vmatprep.subr.mxu0 %v26_v8 }
  0x11   :  { %226 = vmatpush3.msra.mxu0 %v26_v8 }
  0x12   :  { %228 = vmatmul.mubr.msk.f32.vlgmr.msra.gmra.mxu0 %vm41_vm0, %v25_v9 }
  0xd2   :  { %v229_v11 = vpop.f32.mrf.mxu0 }
  0xd3   :  { %v120_v12 = vadd.f32 %v229_v11, %v196_v10 }
  0xd4   :  { %v114_v14 = vpop.f32.mrf.mxu0 }
  0xd5   :  { %v115_v16 = vadd.f32 %v196_v10, %v114_v14  ;;  %v126_v17 = vadd.f32 %v124_v13, %v120_v12 }
  0xd7   :  { %v125_v18 = vadd.f32 %v123_v15, %v115_v16  ;;  %v135_v22 = vmul.f32 %v126_v17, %v126_v17  ;;  %v131_v23 = vsel %vm127_vm1, %v126_v17, 0.0 }
  0xd9   :  { %v128_v19 = vsel %vm127_vm1, %v125_v18, 0.0  ;;  %v134_v20 = vmul.f32 %v125_v18, %v125_v18  ;;  %v139_v24 = vsel %vm127_vm1, %v135_v22, 0.0 }
  0xda   :  { %129 = vadd.xlane.f32.xlu0 %v128_v19 }
  0xdb   :  { %v136_v21 = vsel %vm127_vm1, %v134_v20, 0.0 }
  0xdc   :  { %137 = vadd.xlane.f32.xlu1 %v136_v21 }
  0xde   :  { %132 = vadd.xlane.f32.xlu0 %v131_v23 }
  0xe0   :  { %140 = vadd.xlane.f32.xlu1 %v139_v24 }
 0x163   :  { %v130_v25 = vpop.xlane.xlu0 %129 }
 0x164   :  { %v142_v26 = vmul.f32 0.03125, %v130_v25 }
 0x165   :  { %v138_v27 = vpop.xlane.xlu1 %137 }
 0x166   :  { %v146_v28 = vmul.f32 %v142_v26, %v142_v26  ;;  %v144_v29 = vmul.f32 0.03125, %v138_v27  ;;  %v156_v41 = vsub.f32 %v125_v18, %v142_v26 }
 0x167   :  { %v133_v30 = vpop.xlane.xlu0 %132 }
 0x168   :  { %v148_v31 = vsub.f32 %v144_v29, %v146_v28  ;;  %v143_v32 = vmul.f32 0.03125, %v133_v30 }
 0x169   :  { %v141_v33 = vpop.xlane.xlu1 %140 }
 0x16a   :  { %v150_v34 = vmax.f32 %v148_v31, 0.0  ;;  %v147_v35 = vmul.f32 %v143_v32, %v143_v32  ;;  %v145_v36 = vmul.f32 0.03125, %v141_v33  ;;  %v157_v46 = vsub.f32 %v126_v17, %v143_v32 }
 0x16c   :  { %v152_v37 = vadd.f32 1e-12, %v150_v34  ;;  %v149_v38 = vsub.f32 %v145_v36, %v147_v35 }
 0x16e   :  { %233 = vrsqrt.f32 %v152_v37  ;;  %v151_v39 = vmax.f32 %v149_v38, 0.0 }
 0x170   :  { %v153_v40 = vadd.f32 1e-12, %v151_v39 }
 0x172   :  { %235 = vrsqrt.f32 %v153_v40 }
 0x17b   :  { %v234_v42 = vpop.eup %233 }
 0x17c   :  { %v158_v44 = vmul.f32 %v234_v42, %v156_v41 }
 0x17e   :  { %v167_v47 = vmul.f32 %v199_v43, %v158_v44 }
 0x17f   :  { %v236_v48 = vpop.eup %235 }
 0x180   :  { %v159_v49 = vmul.f32 %v236_v48, %v157_v46  ;;  %v176_v50 = vadd.f32 %v200_v45, %v167_v47 }
 0x182   :  { %v168_v51 = vmul.f32 %v199_v43, %v159_v49  ;;  %178 = vst.msk [vmem:[#allocation2] sm:$0xff] %vm127_vm1, %v176_v50 }
 0x184   :  { %v177_v52 = vadd.f32 %v200_v45, %v168_v51 }
 0x186   :  { %179 = vst.msk [vmem:[#allocation2 + $0x8] sm:$0xff] %vm127_vm1, %v177_v52 }
 0x187   :  { %248 = shalt.err (!%p245_p4)
}
 0x188   :  { %s260_s5 = smov 128   ;;  %s261_s25 = smov 8  }
 0x189   :  { %191 = dma.vmem_to_hbm [thread:$0]  %s186_s24, 256, %s359_s6, [#allocation3], %s260_s5, %s260_s5, %s261_s25  }
 0x18a   :  { %257 = dma.done.wait [#allocation3], 256  }
 0x18b   :  { %258 = vsyncadd [#allocation3], 4294967040 }
 0x18c   :  { %195 = vsyncpa [#allocation3], 1 }

// kernel: tpu_custom_call.1
= control target key start
LH: loop header
LB: loop body
LE: loop exit
PB: predicated region body
PF: predicated region fallthrough
CT: control target
= control target key end

     0   :  { %vm41_vm0 = vcmask 523264   ;;  %s353_s0 = inlined_call_operand.vmem [shape: f32[16,64], index: 0, kind: input, shape index: {}]   ;;  %s354_s1 = inlined_call_operand.vmem [shape: f32[16,32], index: 1, kind: input, shape index: {}]   ;;  %s355_s2 = inlined_call_operand.vmem [shape: f32[64,32], index: 2, kind: input, shape index: {}]   ;;  %s356_s3 = inlined_call_operand.vmem [shape: f32[1,32], index: 3, kind: input, shape index: {}]   ;;  %s357_s4 = inlined_call_operand.vmem [shape: f32[1,32], index: 4, kind: input, shape index: {}]   ;;  %s358_s5 = inlined_call_operand.vmem [shape: f32[1,32], index: 5, kind: input, shape index: {}]   ;;  %s359_s6 = inlined_call_operand.hbm [shape: f32[16,32], index: 6, kind: output, shape index: {}]  }
   0x1   :  { %v33_v0 = vld [vmem:[%s355_s2 + $0x38] sm:$0xff]  ;;  %v32_v1 = vld [vmem:[%s355_s2 + $0x30] sm:$0xff]  ;;  %v31_v2 = vld [vmem:[%s355_s2 + $0x28] sm:$0xff] }
   0x2   :  { %211 = vmatprep.subr.mxu0 %v33_v0  ;;  %v24_v3 = vld [vmem:[%s353_s0] sm:$0xff] }
   0x3   :  { %212 = vmatpush3.msra.mxu0 %v33_v0  ;;  %227 = vmatprep.mubr.msk.f32.mxu0 %vm41_vm0, %v24_v3 }
   0x4   :  { %213 = vmatprep.subr.mxu0 %v32_v1 }
   0x5   :  { %11 = vsyncpa [#allocation3], 0  ;;  %214 = vmatpush3.msra.mxu0 %v32_v1  ;;  %v30_v4 = vld [vmem:[%s355_s2 + $0x20] sm:$0xff]  ;;  %v29_v5 = vld [vmem:[%s355_s2 + $0x18] sm:$0xff]  ;;  %vm127_vm1 = vcmask 261120   ;;  %s259_s23 = smov [#allocation2]  }
   0x6   :  { %215 = vmatprep.subr.mxu0 %v31_v2  ;;  %v28_v6 = vld [vmem:[%s355_s2 + $0x10] sm:$0xff]  ;;  %v27_v7 = vld [vmem:[%s355_s2 + $0x8] sm:$0xff]  ;;  %v26_v8 = vld [vmem:[%s355_s2] sm:$0xff]  ;;  %s185_s24 = sshll.u32 %s259_s23, 4  ;;  %s186_s24 = int_to_ptr.vmem [resolvable:$true] %s185_s24 }
   0x7   :  { %216 = vmatpush3.msra.mxu0 %v31_v2  ;;  %v25_v9 = vld [vmem:[%s353_s0 + $0x8] sm:$0xff]  ;;  %v196_v10 = vld [vmem:[%s356_s3] ss:$0 sm:$0xff]  ;;  %p242_p1 = scmp.lt.s32.totalorder %s186_s24, %s186_s24 }
   0x8   :  { %217 = vmatprep.subr.mxu0 %v30_v4  ;;  %v124_v13 = vld [vmem:[%s354_s1 + $0x8] sm:$0xff]  ;;  %v123_v15 = vld [vmem:[%s354_s1] sm:$0xff] }
   0x9   :  { %218 = vmatpush3.msra.mxu0 %v30_v4  ;;  %v199_v43 = vld [vmem:[%s357_s4] ss:$0 sm:$0xff]  ;;  %s237_s4 = scalar_lea.vmem %s186_s24, 256 }
   0xa   :  { %219 = vmatprep.subr.mxu0 %v29_v5  ;;  %v200_v45 = vld [vmem:[%s358_s5] ss:$0 sm:$0xff]  ;;  %p238_p0 = scmp.ne.s32.totalorder %s186_s24, %s237_s4  ;;  %p243_p2 = scmp.lt.s32.totalorder %s237_s4, %s237_s4 }
   0xb   :  { %220 = vmatpush3.msra.mxu0 %v29_v5 }
   0xc   :  { %221 = vmatprep.subr.mxu0 %v28_v6  ;;  %p244_p3 = por %p243_p2, %p242_p1 }
   0xd   :  { %222 = vmatpush3.msra.mxu0 %v28_v6 }
   0xe   :  { %223 = vmatprep.subr.mxu0 %v27_v7  ;;  %p245_p4 = pnand %p244_p3, %p238_p0 }
   0xf   :  { %224 = vmatpush3.msra.mxu0 %v27_v7 }
  0x10   :  { %225 = vmatprep.subr.mxu0 %v26_v8 }
  0x11   :  { %226 = vmatpush3.msra.mxu0 %v26_v8 }
  0x12   :  { %228 = vmatmul.mubr.msk.f32.vlgmr.msra.gmra.mxu0 %vm41_vm0, %v25_v9 }
  0xd2   :  { %v229_v11 = vpop.f32.mrf.mxu0 }
  0xd3   :  { %v120_v12 = vadd.f32 %v229_v11, %v196_v10 }
  0xd4   :  { %v114_v14 = vpop.f32.mrf.mxu0 }
  0xd5   :  { %v115_v16 = vadd.f32 %v196_v10, %v114_v14  ;;  %v126_v17 = vadd.f32 %v124_v13, %v120_v12 }
  0xd7   :  { %v125_v18 = vadd.f32 %v123_v15, %v115_v16  ;;  %v135_v22 = vmul.f32 %v126_v17, %v126_v17  ;;  %v131_v23 = vsel %vm127_vm1, %v126_v17, 0.0 }
  0xd9   :  { %v128_v19 = vsel %vm127_vm1, %v125_v18, 0.0  ;;  %v134_v20 = vmul.f32 %v125_v18, %v125_v18  ;;  %v139_v24 = vsel %vm127_vm1, %v135_v22, 0.0 }
  0xda   :  { %129 = vadd.xlane.f32.xlu0 %v128_v19 }
  0xdb   :  { %v136_v21 = vsel %vm127_vm1, %v134_v20, 0.0 }
  0xdc   :  { %137 = vadd.xlane.f32.xlu1 %v136_v21 }
  0xde   :  { %132 = vadd.xlane.f32.xlu0 %v131_v23 }
  0xe0   :  { %140 = vadd.xlane.f32.xlu1 %v139_v24 }
 0x163   :  { %v130_v25 = vpop.xlane.xlu0 %129 }
 0x164   :  { %v142_v26 = vmul.f32 0.03125, %v130_v25 }
 0x165   :  { %v138_v27 = vpop.xlane.xlu1 %137 }
 0x166   :  { %v146_v28 = vmul.f32 %v142_v26, %v142_v26  ;;  %v144_v29 = vmul.f32 0.03125, %v138_v27  ;;  %v156_v41 = vsub.f32 %v125_v18, %v142_v26 }
 0x167   :  { %v133_v30 = vpop.xlane.xlu0 %132 }
 0x168   :  { %v148_v31 = vsub.f32 %v144_v29, %v146_v28  ;;  %v143_v32 = vmul.f32 0.03125, %v133_v30 }
 0x169   :  { %v141_v33 = vpop.xlane.xlu1 %140 }
 0x16a   :  { %v150_v34 = vmax.f32 %v148_v31, 0.0  ;;  %v147_v35 = vmul.f32 %v143_v32, %v143_v32  ;;  %v145_v36 = vmul.f32 0.03125, %v141_v33  ;;  %v157_v46 = vsub.f32 %v126_v17, %v143_v32 }
 0x16c   :  { %v152_v37 = vadd.f32 1e-12, %v150_v34  ;;  %v149_v38 = vsub.f32 %v145_v36, %v147_v35 }
 0x16e   :  { %233 = vrsqrt.f32 %v152_v37  ;;  %v151_v39 = vmax.f32 %v149_v38, 0.0 }
 0x170   :  { %v153_v40 = vadd.f32 1e-12, %v151_v39 }
 0x172   :  { %235 = vrsqrt.f32 %v153_v40 }
 0x17b   :  { %v234_v42 = vpop.eup %233 }
 0x17c   :  { %v158_v44 = vmul.f32 %v234_v42, %v156_v41 }
 0x17e   :  { %v167_v47 = vmul.f32 %v199_v43, %v158_v44 }
 0x17f   :  { %v236_v48 = vpop.eup %235 }
 0x180   :  { %v159_v49 = vmul.f32 %v236_v48, %v157_v46  ;;  %v176_v50 = vadd.f32 %v200_v45, %v167_v47 }
 0x182   :  { %v168_v51 = vmul.f32 %v199_v43, %v159_v49  ;;  %178 = vst.msk [vmem:[#allocation2] sm:$0xff] %vm127_vm1, %v176_v50 }
 0x184   :  { %v177_v52 = vadd.f32 %v200_v45, %v168_v51 }
 0x186   :  { %179 = vst.msk [vmem:[#allocation2 + $0x8] sm:$0xff] %vm127_vm1, %v177_v52 }
 0x187   :  { %248 = shalt.err (!%p245_p4)
}
 0x188   :  { %s260_s5 = smov 128   ;;  %s261_s25 = smov 8  }
 0x189   :  { %191 = dma.vmem_to_hbm [thread:$0]  %s186_s24, 256, %s359_s6, [#allocation3], %s260_s5, %s260_s5, %s261_s25  }
 0x18a   :  { %257 = dma.done.wait [#allocation3], 256  }
 0x18b   :  { %258 = vsyncadd [#allocation3], 4294967040 }
 0x18c   :  { %195 = vsyncpa [#allocation3], 1 }

</bundles_post_ra>
